<compile_context>
chip_gen: v7x
topology: tpu7x:2x2x1
jax: 0.10.0
libtpu: 0.0.40
codegen_flags: <defaults>
</compile_context>

<pallas_src>
import functools
import math

import jax
import jax.numpy as jnp
from jax import lax
from jax.experimental import pallas as pl
from jax.experimental.pallas import tpu as pltpu


_FLAT_MAX_BYTES = 4 << 20   # small-input cutoff for the flattened single-block path


# ---------------------------------------------------------------------------
# Parameter setup (deterministic buffer, mirrors torch __init__ math exactly)
# ---------------------------------------------------------------------------
def make_pos_encoding(d_model: int, maxlen: int) -> jnp.ndarray:
    """pos_encoding[:, 0::2] = sin(pos / 10000**(arange(0,d,2)/d)),
       pos_encoding[:, 1::2] = cos(pos / 10000**(arange(1,d,2)/d)).
       Returned shape: (maxlen, 1, d_model) — same as the torch buffer."""
    pos = jnp.arange(0, maxlen, dtype=jnp.float32)[:, None]              # (maxlen, 1)
    sin_den = 10000.0 ** (jnp.arange(0, d_model, 2, dtype=jnp.float32) / d_model)
    cos_den = 10000.0 ** (jnp.arange(1, d_model, 2, dtype=jnp.float32) / d_model)
    pe = jnp.zeros((maxlen, d_model), dtype=jnp.float32)
    pe = pe.at[:, 0::2].set(jnp.sin(pos / sin_den))
    pe = pe.at[:, 1::2].set(jnp.cos(pos / cos_den))
    return pe[:, None, :]                                                 # (maxlen, 1, D)


# ---------------------------------------------------------------------------
# Generation-aware tile sizing (mem-bound elementwise op: big tiles, bounded
# double-buffered VMEM footprint, grid >= 2 for v7x 2-TC sharding).
# ---------------------------------------------------------------------------
def _hw_params():
    kind = ""
    try:
        kind = jax.devices()[0].device_kind.lower()
    except Exception:
        pass
    if "v7" in kind:    # 64 MiB physical VMEM, ~3.2 TB/s HBM
        return dict(target_tile=6 << 20, budget=40 << 20, vmem_limit=48 << 20)
    if "v6" in kind:    # 128 MiB physical VMEM, ~1.4 TB/s HBM
        return dict(target_tile=8 << 20, budget=28 << 20, vmem_limit=64 << 20)
    # v5e / unknown backend: conservative, but state the limit explicitly.
    return dict(target_tile=4 << 20, budget=12 << 20, vmem_limit=32 << 20)


def _choose_block_seq(S: int, B: int, D: int, itemsize: int,
                      target_tile_bytes: int, vmem_budget_bytes: int) -> int:
    row_bytes = B * D * itemsize
    pe_row_bytes = D * 4                       # PE table is f32 (upper bound)
    ts = max(1, target_tile_bytes // row_bytes)

    def footprint(t):
        # double-buffered x-in + out blocks, double-buffered pe blocks
        return 2 * (2 * t * row_bytes) + 2 * t * pe_row_bytes

    while ts > 1 and footprint(ts) > vmem_budget_bytes:
        ts //= 2
    ts = min(ts, S)
    if S >= 16:
        ts = min(ts, -(-S // 2))               # keep >= 2 grid steps (v7x, 2 TCs)
    if ts >= 8:
        ts = (ts // 8) * 8                     # sublane-aligned PE blocks / stores
        if S % 8 == 0:
            # Prefer a multiple of 8 that divides S (no ragged masked last block),
            # but don't shrink the tile by more than 2x for it.
            cand = ts
            while cand >= max(8, ts // 2) and S % cand != 0:
                cand -= 8
            if cand >= 8 and S % cand == 0:
                ts = cand
    return max(1, ts)


def _idx(ndims: int):
    """index_map producing (s, 0, 0, ...); *_ swallows scalar-prefetch refs."""
    def index_map(s, *_):
        return (s,) + (0,) * (ndims - 1)
    return index_map


# ---------------------------------------------------------------------------
# Pallas kernels
# ---------------------------------------------------------------------------
def _add_pe(x, pe):
    if pe.ndim < x.ndim:                       # (ts, D) -> (ts, 1, D)
        pe = pe[:, None, :]
    return x + pe.astype(x.dtype)              # broadcast over batch, x dtype compute


def _pe_add_kernel(x_ref, pe_ref, o_ref):
    o_ref[...] = _add_pe(x_ref[...], pe_ref[...]).astype(o_ref.dtype)


def _pe_add_dropout_kernel(seed_ref, x_ref, pe_ref, o_ref, *, threshold, scale):
    # Inverted dropout (training mode).  Random bits come from a portable
    # integer hash of (seed, global element index): lowers on both Mosaic and
    # the CPU interpreter, and is order-independent so the grid stays "parallel".
    y = _add_pe(x_ref[...], pe_ref[...])
    shape = y.shape
    row_elems = math.prod(shape[1:])

    row = pl.program_id(0) * shape[0] + lax.broadcasted_iota(jnp.int32, shape, 0)
    if y.ndim == 3:
        off = (lax.broadcasted_iota(jnp.int32, shape, 1) * shape[2]
               + lax.broadcasted_iota(jnp.int32, shape, 2))
    else:
        off = lax.broadcasted_iota(jnp.int32, shape, 1)
    idx = (row * row_elems + off).astype(jnp.uint32)

    # lowbias32-style avalanche hash -> uniform uint32 bits
    h = idx + seed_ref[0].astype(jnp.uint32) * jnp.uint32(0x9E3779B9)
    h = h ^ (h >> 16)
    h = h * jnp.uint32(0x21F0AAAD)
    h = h ^ (h >> 15)
    h = h * jnp.uint32(0x735A2D97)
    h = h ^ (h >> 15)

    keep = h >= jnp.uint32(threshold)                      # P(keep) = 1 - p
    y = jnp.where(keep, y * jnp.asarray(scale, y.dtype), jnp.zeros_like(y))
    o_ref[...] = y.astype(o_ref.dtype)


# ---------------------------------------------------------------------------
# Wrapper
# ---------------------------------------------------------------------------
def positional_encoding_forward(token_embedding: jnp.ndarray,
                                pos_encoding: jnp.ndarray,
                                dropout_p: float = 0.1,
                                training: bool = False,
                                seed: int = 0,
                                block_seq: int | None = None,
                                donate_input: bool = False) -> jnp.ndarray:
    """token_embedding: (S, B, D); pos_encoding: (maxlen, 1, D) or (maxlen, D)."""
    S, B, D = token_embedding.shape
    if pos_encoding.ndim == 2:
        pos_encoding = pos_encoding[:, None, :]
    maxlen = pos_encoding.shape[0]
    if pos_encoding.shape != (maxlen, 1, D):
        raise ValueError(f"pos_encoding shape {pos_encoding.shape} != ({maxlen},1,{D})")
    if S > maxlen:
        raise ValueError(f"sequence length {S} exceeds maxlen {maxlen}")

    x = token_embedding
    itemsize = x.dtype.itemsize
    total_bytes = S * B * D * itemsize
    hw = _hw_params()

    use_dropout = bool(training) and float(dropout_p) > 0.0
    if use_dropout and not (0.0 < float(dropout_p) < 1.0):
        # TODO(synk): p == 1.0 (drop everything) is not supported; guard per review.
        raise ValueError("dropout_p must be in [0, 1) for the training path")

    use_flat = total_bytes <= _FLAT_MAX_BYTES and (D % 128 != 0 or B % 8 != 0)

    if use_flat:
        # Small / lane-sparse shapes: one lane-dense (S, B*D) block; PE is
        # pre-broadcast once (cheap at these sizes) so the output is written
        # as a dense slab instead of masked partial stores.
        grid = (1,)
        x_in = x.reshape(S, B * D)
        pe_in = jnp.broadcast_to(pos_encoding[:S].astype(x.dtype),
                                 (S, B, D)).reshape(S, B * D)
        x_block = pe_block = out_block = (S, B * D)
        out_shape = jax.ShapeDtypeStruct((S, B * D), x.dtype)
    else:
        ts = int(block_seq) if block_seq is not None else _choose_block_seq(
            S, B, D, itemsize, hw["target_tile"], hw["budget"])
        grid = (pl.cdiv(S, ts),)
        x_in = x
        x_block = out_block = (ts, B, D)
        if ts % 8 == 0:
            # Dense sublane-packed 2D PE blocks; the full table is passed, the
            # index_map only touches the first cdiv(S, ts) blocks (no slice copy).
            pe_in = pos_encoding.reshape(maxlen, D)
            pe_block = (ts, D)
        else:
            # Tiny-ts fallback: (ts, 1, D) blocks are always layout-legal.
            pe_in = pos_encoding
            pe_block = (ts, 1, D)
        out_shape = jax.ShapeDtypeStruct((S, B, D), x.dtype)

    in_specs = [pl.BlockSpec(x_block, _idx(len(x_block))),
                pl.BlockSpec(pe_block, _idx(len(pe_block)))]
    out_specs = pl.BlockSpec(out_block, _idx(len(out_block)))
    compiler_params = pltpu.CompilerParams(
        dimension_semantics=("parallel",),
        vmem_limit_bytes=hw["vmem_limit"])

    if use_dropout:
        p = float(dropout_p)
        threshold = min(int(round(p * 2 ** 32)), 2 ** 32 - 1)
        kernel = functools.partial(_pe_add_dropout_kernel,
                                   threshold=threshold, scale=1.0 / (1.0 - p))
        grid_spec = pltpu.PrefetchScalarGridSpec(
            num_scalar_prefetch=1, grid=grid,
            in_specs=in_specs, out_specs=out_specs)
        aliases = {1: 0} if donate_input else {}
        out = pl.pallas_call(kernel, out_shape=out_shape, grid_spec=grid_spec,
                             compiler_params=compiler_params,
                             input_output_aliases=aliases)(
            jnp.asarray([seed], dtype=jnp.int32), x_in, pe_in)
    else:
        grid_spec = pltpu.PrefetchScalarGridSpec(
            num_scalar_prefetch=0, grid=grid,
            in_specs=in_specs, out_specs=out_specs)
        aliases = {0: 0} if donate_input else {}
        out = pl.pallas_call(_pe_add_kernel, out_shape=out_shape,
                             grid_spec=grid_spec,
                             compiler_params=compiler_params,
                             input_output_aliases=aliases)(x_in, pe_in)

    return out.reshape(S, B, D) if use_flat else out


# ---------------------------------------------------------------------------
# Demo / correctness check
# ---------------------------------------------------------------------------
if __name__ == "__main__":
    key = jax.random.PRNGKey(0)

    # ---- Case 1: module-like small shapes (flattened lane-dense path) ------
    d_model, maxlen, dropout_p = 32, 64, 0.1
    S, B = 8, 2
    k1, k2 = jax.random.split(key)
    token_embedding = jax.random.normal(k1, (S, B, d_model), dtype=jnp.float32)
    pos_encoding = make_pos_encoding(d_model, maxlen)
    ref = token_embedding + pos_encoding[:S]

    out = positional_encoding_forward(token_embedding, pos_encoding,
                                      dropout_p=dropout_p, training=False)
    out = jax.block_until_ready(out)
    assert out.shape == (S, B, d_model) and out.dtype == token_embedding.dtype
    assert jnp.allclose(out, ref, atol=1e-6, rtol=1e-6)

    out_tr = positional_encoding_forward(token_embedding, pos_encoding,
                                         dropout_p=dropout_p, training=True,
                                         seed=123)
    out_tr = jax.block_until_ready(out_tr)
    scaled = ref / (1.0 - dropout_p)
    ok = (jnp.abs(out_tr) < 1e-6) | (jnp.abs(out_tr - scaled) < 1e-4)
    assert out_tr.shape == (S, B, d_model) and out_tr.dtype == token_embedding.dtype
    assert bool(jnp.all(ok))

    # ---- Case 2: TPU-aligned shapes (tiled 3D path, dense 2D PE blocks) ----
    d2, maxlen2, S2, B2 = 128, 32, 16, 8
    x2 = jax.random.normal(k2, (S2, B2, d2), dtype=jnp.float32)
    pe2 = make_pos_encoding(d2, maxlen2)
    ref2 = x2 + pe2[:S2]

    out2 = positional_encoding_forward(x2, pe2, dropout_p=dropout_p, training=False)
    out2 = jax.block_until_ready(out2)
    assert out2.shape == (S2, B2, d2)
    assert jnp.allclose(out2, ref2, atol=1e-6, rtol=1e-6)

    out2_tr = positional_encoding_forward(x2, pe2, dropout_p=dropout_p,
                                          training=True, seed=7)
    out2_tr = jax.block_until_ready(out2_tr)
    scaled2 = ref2 / (1.0 - dropout_p)
    ok2 = (jnp.abs(out2_tr) < 1e-6) | (jnp.abs(out2_tr - scaled2) < 1e-4)
    assert bool(jnp.all(ok2))

    print("KERNEL_OK")
</pallas_src>

<mosaic_0001>
module attributes {stable_mosaic.version = 11 : i64} {
  func.func @_pe_add_kernel(%arg0: i32, %arg1: memref<8x64xf32, #tpu.memory_space<vmem>>, %arg2: memref<8x64xf32, #tpu.memory_space<vmem>>, %arg3: memref<8x64xf32, #tpu.memory_space<vmem>>) attributes {dimension_semantics = [#tpu.dimension_semantics<parallel>], iteration_bounds = array<i64: 1>, scalar_prefetch = 0 : i64, scratch_operands = 0 : i64, tpu.core_type = #tpu.core_type<tc>, window_params = [{transform_indices = @transform_0, window_bounds = array<i64: 8, 64>}, {transform_indices = @transform_1, window_bounds = array<i64: 8, 64>}, {transform_indices = @transform_2, window_bounds = array<i64: 8, 64>}]} {
    %c0 = arith.constant 0 : index
    %c0_0 = arith.constant 0 : index
    %0 = vector.load %arg1[%c0, %c0_0] : memref<8x64xf32, #tpu.memory_space<vmem>>, vector<8x64xf32>
    %c0_1 = arith.constant 0 : index
    %c0_2 = arith.constant 0 : index
    %1 = vector.load %arg2[%c0_1, %c0_2] : memref<8x64xf32, #tpu.memory_space<vmem>>, vector<8x64xf32>
    %2 = arith.addf %0, %1 : vector<8x64xf32>
    %c0_3 = arith.constant 0 : index
    %c0_4 = arith.constant 0 : index
    %3 = vector.load %arg3[%c0_3, %c0_4] : memref<8x64xf32, #tpu.memory_space<vmem>>, vector<8x64xf32>
    tpu.vector_store %arg3[%c0_3, %c0_4], %2 {strides = array<i32>} : memref<8x64xf32, #tpu.memory_space<vmem>>, vector<8x64xf32>,
    return
  }
  func.func @transform_0(%arg0: i32) -> (i32, i32) {
    %c0_i32 = arith.constant 0 : i32
    %c0_i32_0 = arith.constant 0 : i32
    return %arg0, %c0_i32 : i32, i32
  }
  func.func @transform_1(%arg0: i32) -> (i32, i32) {
    %c0_i32 = arith.constant 0 : i32
    %c0_i32_0 = arith.constant 0 : i32
    return %arg0, %c0_i32 : i32, i32
  }
  func.func @transform_2(%arg0: i32) -> (i32, i32) {
    %c0_i32 = arith.constant 0 : i32
    %c0_i32_0 = arith.constant 0 : i32
    return %arg0, %c0_i32 : i32, i32
  }
}

</mosaic_0001>

<bundles_post_ra>
// kernel: tpu_custom_call.1
= control target key start
LH: loop header
LB: loop body
LE: loop exit
PB: predicated region body
PF: predicated region fallthrough
CT: control target
= control target key end

     0   :  { %7 = vsyncpa [#allocation3], 0  ;;  %s186_s0 = inlined_call_operand.hbm [shape: f32[8,64], index: 0, kind: input, shape index: {}]   ;;  %s187_s1 = inlined_call_operand.hbm [shape: f32[8,64], index: 1, kind: input, shape index: {}]   ;;  %s188_s2 = inlined_call_operand.hbm [shape: f32[8,64], index: 2, kind: output, shape index: {}]  }
   0x1   :  { %8 = vsyncpa [#allocation6], 0 }
   0x2   :  { %9 = vsyncpa [#allocation4], 0  ;;  %s132_s9 = smov [#allocation2]   ;;  %s133_s11 = smov [#allocation5]  }
   0x3   :  { %s16_s10 = sshll.u32 %s132_s9, 4  ;;  %s26_s12 = sshll.u32 %s133_s11, 4  ;;  %s17_s10 = int_to_ptr.vmem [resolvable:$true] %s16_s10  ;;  %s27_s12 = int_to_ptr.vmem [resolvable:$true] %s26_s12 }
   0x4   :  { %s60_s15 = scalar_lea.hbm %s186_s0, 128 }
   0x5   :  { %p61_p0 = scmp.ne.s32.totalorder %s186_s0, %s60_s15  ;;  %p64_p1 = scmp.lt.u32.totalorder %s60_s15, %s186_s0 }
   0x7   :  { %p66_p2 = pnand %p64_p1, %p61_p0 }
   0x9   :  { %69 = shalt.err (!%p66_p2)
}
   0xa   :  { %s70_s20 = scalar_lea.vmem %s17_s10, 128  ;;  %p75_p4 = scmp.lt.s32.totalorder %s17_s10, %s17_s10 }
   0xb   :  { %p71_p3 = scmp.ne.s32.totalorder %s17_s10, %s70_s20  ;;  %p76_p5 = scmp.lt.s32.totalorder %s70_s20, %s70_s20 }
   0xd   :  { %p77_p6 = por %p76_p5, %p75_p4 }
   0xf   :  { %p78_p7 = pnand %p77_p6, %p71_p3 }
  0x11   :  { %81 = shalt.err (!%p78_p7)
}
  0x12   :  { %19 = dma.hbm_to_vmem [thread:$0]  %s186_s0, 128, %s17_s10, [#allocation3]  }
  0x13   :  { %s82_s25 = scalar_lea.hbm %s187_s1, 128 }
  0x14   :  { %p83_p8 = scmp.ne.s32.totalorder %s187_s1, %s82_s25  ;;  %p86_p9 = scmp.lt.u32.totalorder %s82_s25, %s187_s1 }
  0x16   :  { %p88_p10 = pnand %p86_p9, %p83_p8 }
  0x18   :  { %91 = shalt.err (!%p88_p10)
}
  0x19   :  { %s92_s30 = scalar_lea.vmem %s27_s12, 128  ;;  %p97_p12 = scmp.lt.s32.totalorder %s27_s12, %s27_s12 }
  0x1a   :  { %p93_p11 = scmp.ne.s32.totalorder %s27_s12, %s92_s30  ;;  %p98_p13 = scmp.lt.s32.totalorder %s92_s30, %s92_s30 }
  0x1c   :  { %p99_p0 = por %p98_p13, %p97_p12 }
  0x1e   :  { %p100_p1 = pnand %p99_p0, %p93_p11 }
  0x20   :  { %103 = shalt.err (!%p100_p1)
}
  0x21   :  { %29 = dma.hbm_to_vmem [thread:$0]  %s187_s1, 128, %s27_s12, [#allocation6]  }
  0x22   :  { %126 = dma.done.wait [#allocation3], 128  }
  0x23   :  { %127 = vsyncadd [#allocation3], 4294967168 }
  0x24   :  { %128 = dma.done.wait [#allocation6], 128  }
  0x25   :  { %129 = vsyncadd [#allocation6], 4294967168  ;;  %s134_s4 = smov [#allocation7]   ;;  %v36_v0 = vld [vmem:[#allocation2] sm:$0xff]  ;;  %v37_v1 = vld [vmem:[#allocation5] sm:$0xff]  ;;  %vm39_vm0 = vcmask 523264  }
  0x26   :  { %s47_s5 = sshll.u32 %s134_s4, 4  ;;  %v38_v2 = vadd.f32 %v37_v1, %v36_v0  ;;  %s48_s5 = int_to_ptr.vmem [resolvable:$true] %s47_s5 }
  0x27   :  { %s104_s6 = scalar_lea.vmem %s48_s5, 128  ;;  %p109_p3 = scmp.lt.s32.totalorder %s48_s5, %s48_s5 }
  0x28   :  { %40 = vst.msk [vmem:[#allocation7] sm:$0xff] %vm39_vm0, %v38_v2  ;;  %p105_p2 = scmp.ne.s32.totalorder %s48_s5, %s104_s6  ;;  %p110_p4 = scmp.lt.s32.totalorder %s104_s6, %s104_s6 }
  0x2a   :  { %p111_p5 = por %p110_p4, %p109_p3 }
  0x2c   :  { %p112_p6 = pnand %p111_p5, %p105_p2 }
  0x2e   :  { %115 = shalt.err (!%p112_p6)
}
  0x2f   :  { %s116_s8 = scalar_lea.hbm %s188_s2, 128 }
  0x30   :  { %p117_p7 = scmp.ne.s32.totalorder %s188_s2, %s116_s8  ;;  %p120_p8 = scmp.lt.u32.totalorder %s116_s8, %s188_s2 }
  0x32   :  { %p122_p9 = pnand %p120_p8, %p117_p7 }
  0x34   :  { %125 = shalt.err (!%p122_p9)
}
  0x35   :  { %50 = dma.vmem_to_hbm [thread:$0]  %s48_s5, 128, %s188_s2, [#allocation4]  }
  0x36   :  { %130 = dma.done.wait [#allocation4], 128  }
  0x37   :  { %131 = vsyncadd [#allocation4], 4294967168 }
  0x38   :  { %54 = vsyncpa [#allocation3], 1 }
  0x39   :  { %55 = vsyncpa [#allocation6], 1 }
  0x3a   :  { %56 = vsyncpa [#allocation4], 1 }

</bundles_post_ra>
